<compile_context>
chip_gen: v5e
topology: v5e:2x2
jax: 0.10.0
libtpu: 0.0.40
codegen_flags: <defaults>
</compile_context>

<pallas_src>
import functools

import jax
import jax.numpy as jnp
from jax import lax
from jax.experimental import pallas as pl
from jax.experimental.pallas import tpu as pltpu

_LANES = 128


def _round_up(x, m):
    return ((x + m - 1) // m) * m


def _vmem_capacity_bytes():
    try:
        return int(pltpu.get_tpu_info().vmem_capacity_bytes)
    except Exception:
        return 64 * 1024 * 1024  # conservative: v7x per-TC VMEM


def _mlp_kernel(x_ref, w1_ref, b1_ref, w2_ref, b2_ref, w3_ref, b3_ref, o_ref):
    # Resident weights / biases (loop-invariant, loaded once per batch tile).
    w1 = w1_ref[...]
    b1 = b1_ref[...].astype(jnp.float32)
    w2 = w2_ref[...]
    b2 = b2_ref[...].astype(jnp.float32)
    w3 = w3_ref[...].astype(jnp.float32)   # (32, 1)
    b3 = b3_ref[...].astype(jnp.float32)   # (1, 1)

    # 128x128 identity mask: folds a sublane-major (128, 1) column into a lane-dense
    # (1, 128) row (value of row c lands in lane c).  Built once per tile.
    rows = lax.broadcasted_iota(jnp.int32, (_LANES, _LANES), 0)
    cols = lax.broadcasted_iota(jnp.int32, (_LANES, _LANES), 1)
    eye = rows == cols

    n_chunks = o_ref.shape[1]  # = block_rows // 128 (static)

    def body(t, carry):
        start = pl.multiple_of(t * _LANES, _LANES)
        xc = x_ref[pl.ds(start, _LANES), :]                              # (128, D)
        # fc1 + ReLU (MXU, f32 accumulation; epilogue in f32)
        h1 = jnp.dot(xc, w1, preferred_element_type=jnp.float32)
        h1 = jnp.maximum(h1 + b1, 0.0)
        # fc2 + ReLU
        h2 = jnp.dot(h1.astype(w2.dtype), w2, preferred_element_type=jnp.float32)
        h2 = jnp.maximum(h2 + b2, 0.0)
        # fc3 (32 -> 1) on the otherwise-idle MXU -> (128, 1) sublane-major logits.
        z = jnp.dot(h2, w3, preferred_element_type=jnp.float32)
        # Fold to a lane-dense (1, 128) row.  jnp.where (not multiply) so that garbage
        # rows of a ragged last tile (stale VMEM -> possible NaN/inf) cannot leak into
        # valid columns through 0 * inf.
        row = jnp.sum(jnp.where(eye, z, 0.0), axis=0, keepdims=True) + b3  # (1, 128)
        o_ref[0, pl.ds(t, 1), :] = jax.nn.sigmoid(row).astype(o_ref.dtype)
        return carry

    lax.fori_loop(0, n_chunks, body, 0)


def _pick_block_rows(batch, input_dim, x_itemsize):
    d_pad = _round_up(max(input_dim, 1), _LANES)      # x tile is lane-padded in VMEM
    cap = _vmem_capacity_bytes()
    # (a) amortise the ~0.35us per-grid-step overhead: target ~4 MiB of streamed x / step
    by_step = (4 << 20) // (d_pad * x_itemsize)
    # (b) keep the double-buffered x tile well inside VMEM (<= ~40% of capacity)
    by_vmem = (cap * 2 // 5) // (2 * d_pad * x_itemsize)
    bb = max(_LANES, min(by_step, by_vmem, 32768))
    bb = (bb // _LANES) * _LANES
    # (c) at least 2 grid steps when B allows it, so v7x's 2 TensorCores both get work
    if batch > _LANES:
        bb = min(bb, _round_up(pl.cdiv(batch, 2), _LANES))
    return max(_LANES, bb)


@functools.partial(jax.jit, static_argnames=("block_rows", "use_bf16"))
def gender_classifier_forward(x, params, block_rows=None, use_bf16=True):
    """sigmoid(relu(relu(x@w1+b1)@w2+b2)@w3+b3), x: (B, input_dim) -> (B, 1)."""
    B, D = x.shape
    w1, b1 = params["w1"], params["b1"]
    w2, b2 = params["w2"], params["b2"]
    w3, b3 = params["w3"], params["b3"]

    if use_bf16:
        # Halves the streamed HBM bytes of x; free if x already arrives in bf16
        # (otherwise the cast costs one extra pass — pass bf16 in for best results).
        x = x.astype(jnp.bfloat16)
        w1 = w1.astype(jnp.bfloat16)   # resident: dtype is about MXU format, not bandwidth
        w2 = w2.astype(jnp.bfloat16)

    x_item = jnp.dtype(x.dtype).itemsize
    if block_rows is None:
        bb = _pick_block_rows(B, D, x_item)
    else:
        bb = max(_LANES, _round_up(int(block_rows), _LANES))

    n_tiles = pl.cdiv(B, bb)      # no jnp.pad: Pallas clamps the ragged last tile
    n_chunks = bb // _LANES

    # VMEM budget with real padded footprints (x lane-padded to 128, out tile dense).
    d_pad = _round_up(D, _LANES)
    x_bytes = 2 * bb * d_pad * x_item                          # double-buffered x tile
    o_bytes = 2 * _round_up(n_chunks, 8) * _LANES * 4          # double-buffered dense out tile
    w_bytes = 2 * (_round_up(D, 8) * _LANES * jnp.dtype(w1.dtype).itemsize
                   + 64 * _LANES * jnp.dtype(w2.dtype).itemsize
                   + 4 * 8 * _LANES * 4)                       # b1, b2, w3, b3 (padded)
    vmem_limit = int(min(max(x_bytes + o_bytes + w_bytes + (2 << 20), 8 << 20),
                         (_vmem_capacity_bytes() * 3) // 4))

    full = lambda a: pl.BlockSpec(a.shape, lambda i, _nd=a.ndim: (0,) * _nd)

    out = pl.pallas_call(
        _mlp_kernel,
        out_shape=jax.ShapeDtypeStruct((n_tiles, n_chunks, _LANES), jnp.float32),
        grid_spec=pltpu.PrefetchScalarGridSpec(
            num_scalar_prefetch=0,
            grid=(n_tiles,),
            in_specs=[
                pl.BlockSpec((bb, D), lambda i: (i, 0)),       # x: streamed over batch
                full(w1), full(b1), full(w2), full(b2), full(w3), full(b3),
            ],
            out_specs=pl.BlockSpec((1, n_chunks, _LANES), lambda i: (i, 0, 0)),
        ),
        compiler_params=pltpu.CompilerParams(
            dimension_semantics=("parallel",),   # batch tiles are independent (v7x megacore)
            vmem_limit_bytes=vmem_limit,
        ),
    )(x, w1, b1, w2, b2, w3, b3)

    # (tile, chunk, lane) is exactly padded-batch row order; keep only the real rows.
    return out.reshape(-1)[:B].reshape(B, 1)


def init_params(key, input_dim):
    """Deterministic init mimicking PyTorch nn.Linear default (uniform +/- 1/sqrt(fan_in))."""
    def linear(k, fan_in, fan_out):
        kw, kb = jax.random.split(k)
        bound = 1.0 / jnp.sqrt(fan_in)
        w = jax.random.uniform(kw, (fan_in, fan_out), jnp.float32, -bound, bound)
        b = jax.random.uniform(kb, (1, fan_out), jnp.float32, -bound, bound)
        return w, b

    k1, k2, k3 = jax.random.split(key, 3)
    w1, b1 = linear(k1, input_dim, 64)
    w2, b2 = linear(k2, 64, 32)
    w3, b3 = linear(k3, 32, 1)
    return {"w1": w1, "b1": b1, "w2": w2, "b2": b2, "w3": w3, "b3": b3}


def _reference(x, p):
    h1 = jnp.maximum(x @ p["w1"] + p["b1"], 0.0)
    h2 = jnp.maximum(h1 @ p["w2"] + p["b2"], 0.0)
    return jax.nn.sigmoid(h2 @ p["w3"] + p["b3"])


if __name__ == "__main__":
    key = jax.random.PRNGKey(0)
    kx, kp, kx2 = jax.random.split(key, 3)

    input_dim = 32
    params = init_params(kp, input_dim)

    # 1) tiny batch (single partial tile, B < 128): exact f32 path
    x = jax.random.normal(kx, (8, input_dim), dtype=jnp.float32)
    out = jax.block_until_ready(gender_classifier_forward(x, params, use_bf16=False))
    ref = _reference(x, params)
    assert out.shape == (8, 1), out.shape
    assert jnp.allclose(out, ref, atol=1e-5, rtol=1e-5)

    # 2) multi-tile grid with a ragged last tile (300 = 256 + 44), f32 path
    x2 = jax.random.normal(kx2, (300, input_dim), dtype=jnp.float32)
    out2 = jax.block_until_ready(
        gender_classifier_forward(x2, params, block_rows=256, use_bf16=False))
    ref2 = _reference(x2, params)
    assert out2.shape == (300, 1), out2.shape
    assert jnp.allclose(out2, ref2, atol=1e-5, rtol=1e-5)
    assert bool(jnp.all(jnp.isfinite(out2)))

    # 3) default bf16-streamed path (halved HBM traffic), looser tolerance
    out3 = jax.block_until_ready(gender_classifier_forward(x2, params))
    assert out3.shape == (300, 1), out3.shape
    assert float(jnp.max(jnp.abs(out3 - ref2))) < 3e-2
    assert bool(jnp.all(jnp.isfinite(out3)))

    print("KERNEL_OK")
</pallas_src>

<mosaic_0001>
module attributes {stable_mosaic.version = 11 : i64} {
  func.func @_mlp_kernel(%arg0: i32, %arg1: memref<8192x32xf32, #tpu.memory_space<vmem>>, %arg2: memref<32x64xf32, #tpu.memory_space<vmem>>, %arg3: memref<1x64xf32, #tpu.memory_space<vmem>>, %arg4: memref<64x32xf32, #tpu.memory_space<vmem>>, %arg5: memref<1x32xf32, #tpu.memory_space<vmem>>, %arg6: memref<32x1xf32, #tpu.memory_space<vmem>>, %arg7: memref<1x1xf32, #tpu.memory_space<vmem>>, %arg8: memref<1x64x128xf32, #tpu.memory_space<vmem>>) attributes {dimension_semantics = [#tpu.dimension_semantics<parallel>], iteration_bounds = array<i64: 1>, scalar_prefetch = 0 : i64, scratch_operands = 0 : i64, tpu.core_type = #tpu.core_type<tc>, window_params = [{transform_indices = @transform_0, window_bounds = array<i64: 8192, 32>}, {pipeline_mode = #tpu.pipeline_mode<synchronous>, transform_indices = @transform_1, window_bounds = array<i64: 32, 64>}, {pipeline_mode = #tpu.pipeline_mode<synchronous>, transform_indices = @transform_2, window_bounds = array<i64: 1, 64>}, {pipeline_mode = #tpu.pipeline_mode<synchronous>, transform_indices = @transform_3, window_bounds = array<i64: 64, 32>}, {pipeline_mode = #tpu.pipeline_mode<synchronous>, transform_indices = @transform_4, window_bounds = array<i64: 1, 32>}, {pipeline_mode = #tpu.pipeline_mode<synchronous>, transform_indices = @transform_5, window_bounds = array<i64: 32, 1>}, {pipeline_mode = #tpu.pipeline_mode<synchronous>, transform_indices = @transform_6, window_bounds = array<i64: 1, 1>}, {transform_indices = @transform_7, window_bounds = array<i64: 1, 64, 128>}]} {
    %c0 = arith.constant 0 : index
    %c0_0 = arith.constant 0 : index
    %0 = vector.load %arg2[%c0, %c0_0] : memref<32x64xf32, #tpu.memory_space<vmem>>, vector<32x64xf32>
    %c0_1 = arith.constant 0 : index
    %c0_2 = arith.constant 0 : index
    %1 = vector.load %arg3[%c0_1, %c0_2] : memref<1x64xf32, #tpu.memory_space<vmem>>, vector<1x64xf32>
    %c0_3 = arith.constant 0 : index
    %c0_4 = arith.constant 0 : index
    %2 = vector.load %arg4[%c0_3, %c0_4] : memref<64x32xf32, #tpu.memory_space<vmem>>, vector<64x32xf32>
    %c0_5 = arith.constant 0 : index
    %c0_6 = arith.constant 0 : index
    %3 = vector.load %arg5[%c0_5, %c0_6] : memref<1x32xf32, #tpu.memory_space<vmem>>, vector<1x32xf32>
    %c0_7 = arith.constant 0 : index
    %c0_8 = arith.constant 0 : index
    %4 = vector.load %arg6[%c0_7, %c0_8] : memref<32x1xf32, #tpu.memory_space<vmem>>, vector<32x1xf32>
    %c0_9 = arith.constant 0 : index
    %c0_10 = arith.constant 0 : index
    %5 = vector.load %arg7[%c0_9, %c0_10] : memref<1x1xf32, #tpu.memory_space<vmem>>, vector<1x1xf32>
    %6 = tpu.iota {dimensions = array<i32: 0>} : vector<128x128xi32>
    %7 = tpu.iota {dimensions = array<i32: 1>} : vector<128x128xi32>
    %8 = arith.cmpi eq, %6, %7 : vector<128x128xi32>
    %c0_i32 = arith.constant 0 : i32
    %c64_i32 = arith.constant 64 : i32
    %9 = arith.addi %c0_i32, %c64_i32 : i32
    %c1_i32 = arith.constant 1 : i32
    scf.for %arg9 = %c0_i32 to %9 step %c1_i32  : i32 {
      %c128_i32 = arith.constant 128 : i32
      %10 = arith.muli %arg9, %c128_i32 : i32
      %11 = tpu.assume_multiple %10, 128 : i32
      %12 = arith.index_cast %11 : i32 to index
      %c0_12 = arith.constant 0 : index
      %13 = vector.load %arg1[%12, %c0_12] : memref<8192x32xf32, #tpu.memory_space<vmem>>, vector<128x32xf32>
      %cst = arith.constant dense<0.000000e+00> : vector<128x64xf32>
      %14 = tpu.matmul %13, %0, %cst {dimension_numbers = #tpu.dot_dimension_numbers<[1], [0], [0], [1], [0, 0, 1, 1], [], []>} : vector<128x32xf32>, vector<32x64xf32>, vector<128x64xf32> -> vector<128x64xf32>
      %15 = vector.broadcast %1 : vector<1x64xf32> to vector<128x64xf32>
      %16 = arith.addf %14, %15 : vector<128x64xf32>
      %cst_13 = arith.constant 0.000000e+00 : f32
      %17 = vector.broadcast %cst_13 : f32 to vector<128x64xf32>
      %18 = arith.maximumf %16, %17 : vector<128x64xf32>
      %cst_14 = arith.constant dense<0.000000e+00> : vector<128x32xf32>
      %19 = tpu.matmul %18, %2, %cst_14 {dimension_numbers = #tpu.dot_dimension_numbers<[1], [0], [0], [1], [0, 0, 1, 1], [], []>} : vector<128x64xf32>, vector<64x32xf32>, vector<128x32xf32> -> vector<128x32xf32>
      %20 = vector.broadcast %3 : vector<1x32xf32> to vector<128x32xf32>
      %21 = arith.addf %19, %20 : vector<128x32xf32>
      %cst_15 = arith.constant 0.000000e+00 : f32
      %22 = vector.broadcast %cst_15 : f32 to vector<128x32xf32>
      %23 = arith.maximumf %21, %22 : vector<128x32xf32>
      %cst_16 = arith.constant dense<0.000000e+00> : vector<128x1xf32>
      %24 = tpu.matmul %23, %4, %cst_16 {dimension_numbers = #tpu.dot_dimension_numbers<[1], [0], [0], [1], [0, 0, 1, 1], [], []>} : vector<128x32xf32>, vector<32x1xf32>, vector<128x1xf32> -> vector<128x1xf32>
      %cst_17 = arith.constant 0.000000e+00 : f32
      %25 = vector.shape_cast %24 : vector<128x1xf32> to vector<128x1xf32>
      %26 = vector.broadcast %25 : vector<128x1xf32> to vector<128x128xf32>
      %27 = vector.broadcast %cst_17 : f32 to vector<128x128xf32>
      %28 = arith.select %8, %26, %27 : vector<128x128xi1>, vector<128x128xf32>
      %cst_18 = arith.constant dense<0.000000e+00> : vector<128xf32>
      %29 = vector.multi_reduction <add>, %28, %cst_18 [0] : vector<128x128xf32> to vector<128xf32>
      %30 = vector.shape_cast %29 : vector<128xf32> to vector<1x128xf32>
      %31 = vector.broadcast %5 : vector<1x1xf32> to vector<1x128xf32>
      %32 = arith.addf %30, %31 : vector<1x128xf32>
      %33 = arith.negf %32 : vector<1x128xf32>
      %34 = math.exp %33 : vector<1x128xf32>
      %cst_19 = arith.constant 1.000000e+00 : f32
      %35 = vector.broadcast %cst_19 : f32 to vector<1x128xf32>
      %36 = arith.addf %35, %34 : vector<1x128xf32>
      %37 = arith.divf %35, %36 : vector<1x128xf32>
      %c0_20 = arith.constant 0 : index
      %38 = arith.index_cast %arg9 : i32 to index
      %c0_21 = arith.constant 0 : index
      %39 = vector.load %arg8[%c0_20, %38, %c0_21] : memref<1x64x128xf32, #tpu.memory_space<vmem>>, vector<1x1x128xf32>
      %40 = vector.shape_cast %39 : vector<1x1x128xf32> to vector<1x128xf32>
      %41 = vector.shape_cast %37 : vector<1x128xf32> to vector<1x1x128xf32>
      tpu.vector_store %arg8[%c0_20, %38, %c0_21], %41 {strides = array<i32>} : memref<1x64x128xf32, #tpu.memory_space<vmem>>, vector<1x1x128xf32>,
    }
    %c64_i32_11 = arith.constant 64 : i32
    return
  }
  func.func @transform_0(%arg0: i32) -> (i32, i32) {
    %c0_i32 = arith.constant 0 : i32
    %c0_i32_0 = arith.constant 0 : i32
    return %arg0, %c0_i32 : i32, i32
  }
  func.func @transform_1(%arg0: i32) -> (i32, i32) {
    %c0_i32 = arith.constant 0 : i32
    %c0_i32_0 = arith.constant 0 : i32
    %c0_i32_1 = arith.constant 0 : i32
    return %c0_i32, %c0_i32_0 : i32, i32
  }
  func.func @transform_2(%arg0: i32) -> (i32, i32) {
    %c0_i32 = arith.constant 0 : i32
    %c0_i32_0 = arith.constant 0 : i32
    %c0_i32_1 = arith.constant 0 : i32
    return %c0_i32, %c0_i32_0 : i32, i32
  }
  func.func @transform_3(%arg0: i32) -> (i32, i32) {
    %c0_i32 = arith.constant 0 : i32
    %c0_i32_0 = arith.constant 0 : i32
    %c0_i32_1 = arith.constant 0 : i32
    return %c0_i32, %c0_i32_0 : i32, i32
  }
  func.func @transform_4(%arg0: i32) -> (i32, i32) {
    %c0_i32 = arith.constant 0 : i32
    %c0_i32_0 = arith.constant 0 : i32
    %c0_i32_1 = arith.constant 0 : i32
    return %c0_i32, %c0_i32_0 : i32, i32
  }
  func.func @transform_5(%arg0: i32) -> (i32, i32) {
    %c0_i32 = arith.constant 0 : i32
    %c0_i32_0 = arith.constant 0 : i32
    %c0_i32_1 = arith.constant 0 : i32
    return %c0_i32, %c0_i32_0 : i32, i32
  }
  func.func @transform_6(%arg0: i32) -> (i32, i32) {
    %c0_i32 = arith.constant 0 : i32
    %c0_i32_0 = arith.constant 0 : i32
    %c0_i32_1 = arith.constant 0 : i32
    return %c0_i32, %c0_i32_0 : i32, i32
  }
  func.func @transform_7(%arg0: i32) -> (i32, i32, i32) {
    %c0_i32 = arith.constant 0 : i32
    %c0_i32_0 = arith.constant 0 : i32
    %c0_i32_1 = arith.constant 0 : i32
    return %arg0, %c0_i32, %c0_i32_0 : i32, i32, i32
  }
}

</mosaic_0001>

<bundles_post_ra>
// kernel: gender_classifier_forward.1
= control target key start
LH: loop header
LB: loop body
LE: loop exit
PB: predicated region body
PF: predicated region fallthrough
CT: control target
= control target key end

     0   :  { %v47_v0 = vlaneseq  ;;  %s1150_s0 = inlined_call_operand.vmem [shape: f32[8,32], index: 0, kind: input, shape index: {}]   ;;  %s1151_s1 = inlined_call_operand.vmem [shape: f32[32,64], index: 1, kind: input, shape index: {}]   ;;  %s1152_s2 = inlined_call_operand.vmem [shape: f32[1,64], index: 2, kind: input, shape index: {}]   ;;  %s1153_s3 = inlined_call_operand.vmem [shape: f32[64,32], index: 3, kind: input, shape index: {}]   ;;  %s1154_s6 = inlined_call_operand.<no memory space> [shape: f32[1,1], index: 6, kind: input, shape index: {}]   ;;  %s1155_s7 = inlined_call_operand.vmem [shape: f32[1,64,128], index: 7, kind: output, shape index: {}]   ;;  %s1156_s4 = inlined_call_operand.vmem [shape: f32[1,32], index: 4, kind: input, shape index: {}]   ;;  %s1157_s5 = inlined_call_operand.vmem [shape: f32[32,1], index: 5, kind: input, shape index: {}]  }
   0x1   :  { %v12_v1 = vstv %s1154_s6  ;;  %v779_v2 = vld [vmem:[%s1151_s1] sm:$0xff]  ;;  %v784_v3 = vld [vmem:[%s1151_s1 + $0x8] sm:$0xff]  ;;  %v789_v4 = vld [vmem:[%s1151_s1 + $0x10] sm:$0xff] }
   0x2   :  { %13 = vst [vmem:[#allocation2] sm:$0x1] %v12_v1  ;;  %v794_v5 = vld [vmem:[%s1151_s1 + $0x18] sm:$0xff]  ;;  %v799_v6 = vld [vmem:[%s1152_s2] sm:$0x1]  ;;  %v809_v8 = vld [vmem:[%s1153_s3 + $0x8] sm:$0xff] }
   0x3   :  { %v804_v7 = vld [vmem:[%s1153_s3] sm:$0xff]  ;;  %v814_v9 = vld [vmem:[%s1153_s3 + $0x10] sm:$0xff]  ;;  %v819_v10 = vld [vmem:[%s1153_s3 + $0x18] sm:$0xff]  ;;  %v821_v11 = vshrl.u32 %v47_v0, 7  ;;  %v823_v12 = vand.u32 127, %v47_v0 }
   0x4   :  { %v828_v13 = vld [vmem:[%s1153_s3 + $0x20] sm:$0xff]  ;;  %v833_v14 = vld [vmem:[%s1153_s3 + $0x28] sm:$0xff]  ;;  %v838_v15 = vld [vmem:[%s1153_s3 + $0x30] sm:$0xff] }
   0x5   :  { %v843_v16 = vld [vmem:[%s1153_s3 + $0x38] sm:$0xff]  ;;  %v848_v17 = vld [vmem:[%s1156_s4] sm:$0x1]  ;;  %v856_v19 = vadd.s32 8, %v821_v11  ;;  %v859_v20 = vadd.s32 16, %v821_v11  ;;  %v866_v21 = vld [vmem:[%s1157_s5 + $0x8] sm:$0xff] }
   0x6   :  { %v853_v18 = vld [vmem:[%s1157_s5] sm:$0xff]  ;;  %v871_v22 = vld [vmem:[%s1157_s5 + $0x10] sm:$0xff]  ;;  %v876_v23 = vld [vmem:[%s1157_s5 + $0x18] sm:$0xff]  ;;  %v879_v24 = vadd.s32 24, %v821_v11  ;;  %v882_v25 = vadd.s32 32, %v821_v11  ;;  %v885_v26 = vadd.s32 40, %v821_v11 }
   0x7   :  { %v888_v27 = vadd.s32 48, %v821_v11  ;;  %v891_v28 = vadd.s32 56, %v821_v11  ;;  %v894_v29 = vadd.s32 64, %v821_v11  ;;  %v897_v30 = vadd.s32 72, %v821_v11  ;;  %s949_s5 = smov 0  }
   0x8   :  { %v900_v31 = vadd.s32 80, %v821_v11  ;;  %v903_v32 = vadd.s32 88, %v821_v11  ;;  %v906_v33 = vadd.s32 96, %v821_v11  ;;  %v909_v34 = vadd.s32 104, %v821_v11 }
   0x9   :  { %v911_v35 = vld [vmem:[#allocation2] sm:$0x1]  ;;  %v914_v36 = vadd.s32 112, %v821_v11  ;;  %v917_v37 = vadd.s32 120, %v821_v11  ;;  %vm68_vm2 = vcmp.eq.s32.totalorder %v859_v20, %v823_v12  ;;  %vm69_vm3 = vcmp.eq.s32.totalorder %v879_v24, %v823_v12 }
   0xa   :  { %vm70_vm4 = vcmp.eq.s32.totalorder %v882_v25, %v823_v12  ;;  %vm71_vm5 = vcmp.eq.s32.totalorder %v885_v26, %v823_v12  ;;  %vm72_vm6 = vcmp.eq.s32.totalorder %v888_v27, %v823_v12  ;;  %vm73_vm7 = vcmp.eq.s32.totalorder %v891_v28, %v823_v12 }
   0xb   :  { %vm74_vm8 = vcmp.eq.s32.totalorder %v894_v29, %v823_v12  ;;  %vm75_vm9 = vcmp.eq.s32.totalorder %v897_v30, %v823_v12  ;;  %vm76_vm10 = vcmp.eq.s32.totalorder %v900_v31, %v823_v12  ;;  %vm77_vm11 = vcmp.eq.s32.totalorder %v903_v32, %v823_v12 }
   0xc   :  { %vm78_vm12 = vcmp.eq.s32.totalorder %v906_v33, %v823_v12  ;;  %vm79_vm13 = vcmp.eq.s32.totalorder %v909_v34, %v823_v12 }
   0xd LB: > { %170 = vmatpush.msra.mxu0 %v794_v5  ;;  %692 = vmatpush.msra.mxu3 %v794_v5  ;;  %s642_s6 = sshll.u32 %s730_s5, 7  ;;  %vm109_vm15 = vcmask 261120   ;;  %v1025_v54 = vperm.slane %v799_v6, 0  ;;  %vm242_vm14 = vcmask 523264   ;;  %vm1158_vm1 = vcmp.eq.s32.totalorder %v856_v19, %v823_v12  ;;  %s628_s16 = scalar_lea.vmem %s1155_s7, %s730_s5  ;;  %s730_s5 = sphi %s949_s5, %s87_s5  }
   0xe   : > { %299 = vmatpush.msra.mxu1 %v843_v16  ;;  %432 = vmatpush.msra.mxu2 %v876_v23  ;;  %s964_s13 = scalar_lea.vmem %s1150_s0, %s642_s6  ;;  %vm1159_vm0 = vcmp.eq.s32.totalorder %v821_v11, %v823_v12  ;;  %s87_s5 = sadd.s32 1, %s730_s5  }
   0xf   : > { %171 = vmatpush.msra.mxu0 %v789_v4  ;;  %693 = vmatpush.msra.mxu3 %v789_v4  ;;  %v90_v38 = vld [vmem:[%s964_s13] sm:$0xff]  ;;  %v91_v39 = vld [vmem:[%s964_s13 + $0x8] sm:$0xff]  ;;  %v92_v40 = vld [vmem:[%s964_s13 + $0x10] sm:$0xff]  ;;  %p84_p0 = scmp.ge.s32.totalorder %s87_s5, 64  }
  0x10   : > { %300 = vmatpush.msra.mxu1 %v838_v15  ;;  %433 = vmatpush.msra.mxu2 %v871_v22  ;;  %v93_v41 = vld [vmem:[%s964_s13 + $0x18] sm:$0xff]  ;;  %v94_v42 = vld [vmem:[%s964_s13 + $0x20] sm:$0xff]  ;;  %v95_v43 = vld [vmem:[%s964_s13 + $0x28] sm:$0xff] }
  0x11   : > { %172 = vmatpush.msra.mxu0 %v784_v3  ;;  %694 = vmatpush.msra.mxu3 %v784_v3  ;;  %v96_v44 = vld [vmem:[%s964_s13 + $0x30] sm:$0xff]  ;;  %v97_v45 = vld [vmem:[%s964_s13 + $0x38] sm:$0xff]  ;;  %v98_v46 = vld [vmem:[%s964_s13 + $0x40] sm:$0xff] }
  0x12   : > { %301 = vmatpush.msra.mxu1 %v833_v14  ;;  %434 = vmatpush.msra.mxu2 %v866_v21  ;;  %v103_v47 = vld [vmem:[%s964_s13 + $0x68] sm:$0xff]  ;;  %v104_v49 = vld [vmem:[%s964_s13 + $0x70] sm:$0xff]  ;;  %v105_v51 = vld [vmem:[%s964_s13 + $0x78] sm:$0xff] }
  0x13   : > { %173 = vmatpush.msra.mxu0 %v779_v2  ;;  %695 = vmatpush.msra.mxu3 %v779_v2  ;;  %v99_v48 = vld [vmem:[%s964_s13 + $0x48] sm:$0xff]  ;;  %v100_v50 = vld [vmem:[%s964_s13 + $0x50] sm:$0xff]  ;;  %v101_v52 = vld [vmem:[%s964_s13 + $0x58] sm:$0xff] }
  0x14   : > { %643 = vmatmul.msk.f32.vlgmr.msra.gmra.mxu0 %vm109_vm15, %v90_v38  ;;  %302 = vmatpush.msra.mxu1 %v828_v13  ;;  %v102_v53 = vld [vmem:[%s964_s13 + $0x60] sm:$0xff] }
  0x15   : > { %696 = vmatpush.msrb.mxu3 %v843_v16  ;;  %435 = vmatpush.msra.mxu2 %v853_v18 }
  0x16   : > { %303 = vmatpush.msra.mxu1 %v819_v10  ;;  %656 = vmatmul.msk.f32.vlgmr.msra.gmra.mxu3 %vm109_vm15, %v103_v47 }
  0x17   : > { %697 = vmatpush.msrb.mxu3 %v838_v15 }
  0x18   : > { %304 = vmatpush.msra.mxu1 %v814_v9 }
  0x19   : > { %698 = vmatpush.msrb.mxu3 %v833_v14 }
  0x1a   : > { %305 = vmatpush.msra.mxu1 %v809_v8 }
  0x1b   : > { %699 = vmatpush.msrb.mxu3 %v828_v13 }
  0x1c   : > { %644 = vmatmul.msk.f32.gmra.mxu0 %vm109_vm15, %v91_v39  ;;  %306 = vmatpush.msra.mxu1 %v804_v7 }
  0x1d   : > { %700 = vmatpush.msrb.mxu3 %v819_v10 }
  0x1e   : > { %657 = vmatmul.msk.f32.gmra.mxu3 %vm109_vm15, %v104_v49 }
  0x1f   : > { %701 = vmatpush.msrb.mxu3 %v814_v9 }
  0x21   : > { %702 = vmatpush.msrb.mxu3 %v809_v8 }
  0x23   : > { %703 = vmatpush.msrb.mxu3 %v804_v7 }
  0x24   : > { %645 = vmatmul.msk.f32.gmra.mxu0 %vm109_vm15, %v92_v40 }
  0x25   : > { %704 = vmatpush.msra.mxu3 %v876_v23 }
  0x26   : > { %658 = vmatmul.msk.f32.gmra.mxu3 %vm109_vm15, %v105_v51 }
  0x27   : > { %705 = vmatpush.msra.mxu3 %v871_v22 }
  0x29   : > { %706 = vmatpush.msra.mxu3 %v866_v21 }
  0x2b   : > { %707 = vmatpush.msra.mxu3 %v853_v18 }
  0x2c   : > { %646 = vmatmul.msk.f32.gmra.mxu0 %vm109_vm15, %v93_v41 }
  0x34   : > { %647 = vmatmul.msk.f32.gmra.mxu0 %vm109_vm15, %v94_v42 }
  0x3c   : > { %648 = vmatmul.msk.f32.gmra.mxu0 %vm109_vm15, %v95_v43 }
  0x44   : > { %649 = vmatmul.msk.f32.gmra.mxu0 %vm109_vm15, %v96_v44 }
  0x4c   : > { %650 = vmatmul.msk.f32.gmra.mxu0 %vm109_vm15, %v97_v45 }
  0x54   : > { %651 = vmatmul.msk.f32.gmra.mxu0 %vm109_vm15, %v98_v46 }
  0x5c   : > { %652 = vmatmul.msk.f32.gmra.mxu0 %vm109_vm15, %v99_v48 }
  0x64   : > { %653 = vmatmul.msk.f32.gmra.mxu0 %vm109_vm15, %v100_v50 }
  0x6c   : > { %654 = vmatmul.msk.f32.gmra.mxu0 %vm109_vm15, %v101_v52 }
  0x74   : > { %655 = vmatmul.msk.f32.gmra.mxu0 %vm109_vm15, %v102_v53 }
  0x91   : > { %v175_v55 = vpop.f32.mrf.mxu0 }
  0x92   : > { %v176_v56 = vadd.f32 %v175_v55, %v1025_v54 }
  0x94   : > { %v223_v57 = vmax.f32 %v176_v56, 0.0 }
  0x96   : > { %659 = vmatmul.msk.f32.vlgmr.msra.gmra.mxu1 %vm242_vm14, %v223_v57 }
  0x99   : > { %v178_v58 = vpop.f32.mrf.mxu0 }
  0x9a   : > { %v179_v59 = vadd.f32 %v178_v58, %v1025_v54 }
  0x9c   : > { %v224_v60 = vmax.f32 %v179_v59, 0.0 }
  0x9e   : > { %660 = vmatmul.msk.f32.gmra.mxu1 %vm242_vm14, %v224_v60 }
  0xa1   : > { %v181_v61 = vpop.f32.mrf.mxu0 }
  0xa2   : > { %v182_v62 = vadd.f32 %v181_v61, %v1025_v54 }
  0xa4   : > { %v225_v63 = vmax.f32 %v182_v62, 0.0 }
  0xa6   : > { %661 = vmatmul.msk.f32.gmra.mxu1 %vm242_vm14, %v225_v63 }
  0xa9   : > { %v184_v0 = vpop.f32.mrf.mxu0 }
  0xaa   : > { %v185_v1 = vadd.f32 %v184_v0, %v1025_v54  ;;  %v214_v0 = vpop.f32.mrf.mxu3 }
  0xac   : > { %v226_v38 = vmax.f32 %v185_v1, 0.0 }
  0xae   : > { %662 = vmatmul.msk.f32.gmra.mxu1 %vm242_vm14, %v226_v38 }
  0xb1   : > { %v187_v39 = vpop.f32.mrf.mxu0 }
  0xb2   : > { %v188_v40 = vadd.f32 %v187_v39, %v1025_v54 }
  0xb4   : > { %v227_v41 = vmax.f32 %v188_v40, 0.0  ;;  %v215_v40 = vadd.f32 %v214_v0, %v1025_v54 }
  0xb6   : > { %663 = vmatmul.msk.f32.gmra.mxu1 %vm242_vm14, %v227_v41  ;;  %v217_v41 = vpop.f32.mrf.mxu3 }
  0xb9   : > { %v190_v42 = vpop.f32.mrf.mxu0 }
  0xba   : > { %v191_v43 = vadd.f32 %v190_v42, %v1025_v54  ;;  %v236_v42 = vmax.f32 %v215_v40, 0.0 }
  0xbc   : > { %v228_v44 = vmax.f32 %v191_v43, 0.0  ;;  %v218_v43 = vadd.f32 %v217_v41, %v1025_v54 }
  0xbe   : > { %664 = vmatmul.msk.f32.gmra.mxu1 %vm242_vm14, %v228_v44  ;;  %v237_v44 = vmax.f32 %v218_v43, 0.0 }
  0xc1   : > { %v193_v45 = vpop.f32.mrf.mxu0 }
  0xc2   : > { %v194_v46 = vadd.f32 %v193_v45, %v1025_v54  ;;  %v220_v45 = vpop.f32.mrf.mxu3 }
  0xc4   : > { %v229_v47 = vmax.f32 %v194_v46, 0.0  ;;  %v221_v46 = vadd.f32 %v220_v45, %v1025_v54 }
  0xc6   : > { %665 = vmatmul.msk.f32.gmra.mxu1 %vm242_vm14, %v229_v47  ;;  %v238_v47 = vmax.f32 %v221_v46, 0.0 }
  0xc9   : > { %v196_v48 = vpop.f32.mrf.mxu0 }
  0xca   : > { %v197_v49 = vadd.f32 %v196_v48, %v1025_v54  ;;  %v1060_v48 = vperm.slane %v848_v17, 0 }
  0xcc   : > { %v230_v50 = vmax.f32 %v197_v49, 0.0 }
  0xce   : > { %666 = vmatmul.msk.f32.gmra.mxu1 %vm242_vm14, %v230_v50 }
  0xd1   : > { %v199_v51 = vpop.f32.mrf.mxu0 }
  0xd2   : > { %v200_v52 = vadd.f32 %v199_v51, %v1025_v54 }
  0xd4   : > { %v231_v53 = vmax.f32 %v200_v52, 0.0 }
  0xd6   : > { %667 = vmatmul.msk.f32.gmra.mxu1 %vm242_vm14, %v231_v53 }
  0xd9   : > { %v202_v55 = vpop.f32.mrf.mxu0 }
  0xda   : > { %v203_v56 = vadd.f32 %v202_v55, %v1025_v54 }
  0xdc   : > { %v232_v57 = vmax.f32 %v203_v56, 0.0 }
  0xde   : > { %668 = vmatmul.msk.f32.gmra.mxu1 %vm242_vm14, %v232_v57 }
  0xe1   : > { %v205_v58 = vpop.f32.mrf.mxu0 }
  0xe2   : > { %v206_v59 = vadd.f32 %v205_v58, %v1025_v54 }
  0xe4   : > { %v233_v60 = vmax.f32 %v206_v59, 0.0 }
  0xe6   : > { %669 = vmatmul.msk.f32.gmra.mxu1 %vm242_vm14, %v233_v60 }
  0xe9   : > { %v208_v61 = vpop.f32.mrf.mxu0 }
  0xea   : > { %v209_v62 = vadd.f32 %v208_v61, %v1025_v54 }
  0xec   : > { %v234_v63 = vmax.f32 %v209_v62, 0.0 }
  0xee   : > { %670 = vmatmul.msk.f32.gmra.mxu1 %vm242_vm14, %v234_v63 }
  0xf1   : > { %v211_v1 = vpop.f32.mrf.mxu0 }
  0xf2   : > { %v212_v38 = vadd.f32 %v211_v1, %v1025_v54 }
  0xf4   : > { %v235_v39 = vmax.f32 %v212_v38, 0.0 }
  0xf6   : > { %671 = vmatmul.msk.f32.vlgmr.msrb.gmra.mxu3 %vm242_vm14, %v235_v39 }
  0xfe   : > { %672 = vmatmul.msk.f32.gmra.mxu3 %vm242_vm14, %v236_v42 }
 0x106   : > { %673 = vmatmul.msk.f32.gmra.mxu3 %vm242_vm14, %v237_v44 }
 0x10e   : > { %674 = vmatmul.msk.f32.gmra.mxu3 %vm242_vm14, %v238_v47  ;;  %vm1160_vm14 = vcmp.eq.s32.totalorder %v914_v36, %v823_v12 }
 0x113   : > { %v308_v49 = vpop.f32.mrf.mxu1 }
 0x114   : > { %v309_v50 = vadd.f32 %v308_v49, %v1060_v48 }
 0x116   : > { %v356_v51 = vmax.f32 %v309_v50, 0.0 }
 0x118   : > { %675 = vmatmul.msk.f32.vlgmr.msra.gmra.mxu2 %vm109_vm15, %v356_v51 }
 0x11b   : > { %v311_v52 = vpop.f32.mrf.mxu1 }
 0x11c   : > { %v312_v53 = vadd.f32 %v311_v52, %v1060_v48 }
 0x11e   : > { %v357_v55 = vmax.f32 %v312_v53, 0.0 }
 0x120   : > { %676 = vmatmul.msk.f32.gmra.mxu2 %vm109_vm15, %v357_v55 }
 0x123   : > { %v314_v56 = vpop.f32.mrf.mxu1 }
 0x124   : > { %v315_v54 = vadd.f32 %v314_v56, %v1060_v48 }
 0x126   : > { %v358_v57 = vmax.f32 %v315_v54, 0.0 }
 0x128   : > { %677 = vmatmul.msk.f32.gmra.mxu2 %vm109_vm15, %v358_v57 }
 0x12b   : > { %v317_v58 = vpop.f32.mrf.mxu1 }
 0x12c   : > { %v318_v59 = vadd.f32 %v317_v58, %v1060_v48  ;;  %v732_v58 = vmov 0  }
 0x12d   : > { %717 = vset.pattern.permute.xlu0 %v732_v58  ;;  %718 = vset.pattern.permute.xlu1 %v732_v58 }
 0x12e   : > { %v359_v60 = vmax.f32 %v318_v59, 0.0  ;;  %719 = vset.pattern.permute.xlu2 %v732_v58 }
 0x130   : > { %678 = vmatmul.msk.f32.gmra.mxu2 %vm109_vm15, %v359_v60 }
 0x133   : > { %v320_v61 = vpop.f32.mrf.mxu1 }
 0x134   : > { %v321_v62 = vadd.f32 %v320_v61, %v1060_v48 }
 0x136   : > { %v360_v63 = vmax.f32 %v321_v62, 0.0 }
 0x138   : > { %679 = vmatmul.msk.f32.gmra.mxu2 %vm109_vm15, %v360_v63 }
 0x13b   : > { %v323_v0 = vpop.f32.mrf.mxu1 }
 0x13c   : > { %v324_v1 = vadd.f32 %v323_v0, %v1060_v48 }
 0x13e   : > { %v361_v38 = vmax.f32 %v324_v1, 0.0 }
 0x140   : > { %680 = vmatmul.msk.f32.gmra.mxu2 %vm109_vm15, %v361_v38 }
 0x143   : > { %v326_v39 = vpop.f32.mrf.mxu1 }
 0x144   : > { %v327_v40 = vadd.f32 %v326_v39, %v1060_v48 }
 0x146   : > { %v362_v41 = vmax.f32 %v327_v40, 0.0 }
 0x148   : > { %681 = vmatmul.msk.f32.gmra.mxu2 %vm109_vm15, %v362_v41 }
 0x14b   : > { %v329_v42 = vpop.f32.mrf.mxu1 }
 0x14c   : > { %v330_v43 = vadd.f32 %v329_v42, %v1060_v48 }
 0x14e   : > { %v363_v44 = vmax.f32 %v330_v43, 0.0 }
 0x150   : > { %682 = vmatmul.msk.f32.gmra.mxu2 %vm109_vm15, %v363_v44 }
 0x153   : > { %v332_v45 = vpop.f32.mrf.mxu1 }
 0x154   : > { %v333_v46 = vadd.f32 %v332_v45, %v1060_v48 }
 0x156   : > { %v364_v47 = vmax.f32 %v333_v46, 0.0 }
 0x158   : > { %683 = vmatmul.msk.f32.gmra.mxu2 %vm109_vm15, %v364_v47 }
 0x15b   : > { %v335_v49 = vpop.f32.mrf.mxu1 }
 0x15c   : > { %v336_v50 = vadd.f32 %v335_v49, %v1060_v48 }
 0x15e   : > { %v365_v51 = vmax.f32 %v336_v50, 0.0 }
 0x160   : > { %684 = vmatmul.msk.f32.gmra.mxu2 %vm109_vm15, %v365_v51 }
 0x163   : > { %v338_v52 = vpop.f32.mrf.mxu1 }
 0x164   : > { %v339_v53 = vadd.f32 %v338_v52, %v1060_v48 }
 0x166   : > { %v366_v55 = vmax.f32 %v339_v53, 0.0 }
 0x168   : > { %685 = vmatmul.msk.f32.gmra.mxu2 %vm109_vm15, %v366_v55 }
 0x16b   : > { %v341_v56 = vpop.f32.mrf.mxu1 }
 0x16c   : > { %v342_v54 = vadd.f32 %v341_v56, %v1060_v48 }
 0x16e   : > { %v367_v57 = vmax.f32 %v342_v54, 0.0 }
 0x170   : > { %686 = vmatmul.msk.f32.gmra.mxu2 %vm109_vm15, %v367_v57 }
 0x179   : > { %v344_v59 = vpop.f32.mrf.mxu3 }
 0x17a   : > { %v345_v60 = vadd.f32 %v344_v59, %v1060_v48 }
 0x17c   : > { %v368_v61 = vmax.f32 %v345_v60, 0.0 }
 0x17e   : > { %687 = vmatmul.msk.f32.gmra.mxu2 %vm109_vm15, %v368_v61 }
 0x181   : > { %v347_v62 = vpop.f32.mrf.mxu3 }
 0x182   : > { %v348_v63 = vadd.f32 %v347_v62, %v1060_v48 }
 0x184   : > { %v369_v0 = vmax.f32 %v348_v63, 0.0 }
 0x186   : > { %688 = vmatmul.msk.f32.vlgmr.msra.gmra.mxu3 %vm109_vm15, %v369_v0 }
 0x189   : > { %v350_v1 = vpop.f32.mrf.mxu3 }
 0x18a   : > { %v351_v38 = vadd.f32 %v350_v1, %v1060_v48 }
 0x18c   : > { %v370_v39 = vmax.f32 %v351_v38, 0.0 }
 0x18e   : > { %689 = vmatmul.msk.f32.gmra.mxu3 %vm109_vm15, %v370_v39 }
 0x191   : > { %v353_v40 = vpop.f32.mrf.mxu3 }
 0x192   : > { %v354_v41 = vadd.f32 %v353_v40, %v1060_v48 }
 0x194   : > { %v371_v42 = vmax.f32 %v354_v41, 0.0 }
 0x196   : > { %690 = vmatmul.msk.f32.gmra.mxu3 %vm109_vm15, %v371_v42  ;;  %vm1161_vm15 = vcmp.eq.s32.totalorder %v917_v37, %v823_v12 }
 0x19b   : > { %v437_v43 = vpop.f32.mrf.mxu2 }
 0x19c   : > { %487 = vperm.xlu0 %717, %v437_v43  }
 0x1a3   : > { %v440_v44 = vpop.f32.mrf.mxu2 }
 0x1a4   : > { %492 = vperm.xlu0 %717, %v440_v44  }
 0x1ab   : > { %v443_v45 = vpop.f32.mrf.mxu2 }
 0x1ac   : > { %497 = vperm.xlu1 %718, %v443_v45  }
 0x1b3   : > { %v446_v46 = vpop.f32.mrf.mxu2 }
 0x1b4   : > { %502 = vperm.xlu1 %718, %v446_v46  }
 0x1bb   : > { %v449_v47 = vpop.f32.mrf.mxu2 }
 0x1bc   : > { %507 = vperm.xlu2 %719, %v449_v47  }
 0x1c3   : > { %v452_v49 = vpop.f32.mrf.mxu2 }
 0x1c4   : > { %512 = vperm.xlu2 %719, %v452_v49  }
 0x1cb   : > { %v455_v50 = vpop.f32.mrf.mxu2 }
 0x1cc   : > { %517 = vperm.xlu0 %717, %v455_v50  }
 0x1d3   : > { %v458_v51 = vpop.f32.mrf.mxu2 }
 0x1d4   : > { %522 = vperm.xlu1 %718, %v458_v51  }
 0x1db   : > { %v461_v48 = vpop.f32.mrf.mxu2 }
 0x1dc   : > { %527 = vperm.xlu2 %719, %v461_v48  }
 0x1e3   : > { %v464_v52 = vpop.f32.mrf.mxu2 }
 0x1e4   : > { %532 = vperm.xlu0 %717, %v464_v52  }
 0x1eb   : > { %v467_v53 = vpop.f32.mrf.mxu2 }
 0x1ec   : > { %537 = vperm.xlu1 %718, %v467_v53  }
 0x1f3   : > { %v470_v55 = vpop.f32.mrf.mxu2 }
 0x1f4   : > { %542 = vperm.xlu2 %719, %v470_v55  }
 0x201   : > { %v473_v56 = vpop.f32.mrf.mxu2 }
 0x202   : > { %547 = vperm.xlu0 %717, %v473_v56  }
 0x209   : > { %v476_v54 = vpop.f32.mrf.mxu3 }
 0x20a   : > { %552 = vperm.xlu1 %718, %v476_v54  }
 0x20e   : > { %v488_v59 = vpop.permute.xlu0 %487 }
 0x20f   : > { %v565_v1 = vsel %vm1159_vm0, %v488_v59, 0.0 }
 0x211   : > { %v479_v57 = vpop.f32.mrf.mxu3 }
 0x212   : > { %604 = vperm.xlu1 %718, %v911_v35   ;;  %557 = vperm.xlu2 %719, %v479_v57  }
 0x216   : > { %v493_v61 = vpop.permute.xlu0 %492  ;;  %v508_v63 = vpop.permute.xlu2 %507 }
 0x217   : > { %v566_v62 = vsel %vm1158_vm1, %v493_v61, 0.0  ;;  %v569_v43 = vsel %vm70_vm4, %v508_v63, 0.0 }
 0x218   : > { %v581_v39 = vadd.f32 %v566_v62, %v565_v1 }
 0x219   : > { %v482_v58 = vpop.f32.mrf.mxu3 }
 0x21a   : > { %562 = vperm.xlu0 %717, %v482_v58  }
 0x21e   : > { %v498_v60 = vpop.permute.xlu1 %497  ;;  %v513_v44 = vpop.permute.xlu2 %512 }
 0x21f   : > { %v567_v38 = vsel %vm68_vm2, %v498_v60, 0.0  ;;  %v570_v49 = vsel %vm71_vm5, %v513_v44, 0.0 }
 0x220   : > { %v582_v41 = vadd.f32 %v581_v39, %v567_v38 }
 0x226   : > { %v503_v0 = vpop.permute.xlu1 %502 }
 0x227   : > { %v568_v40 = vsel %vm69_vm3, %v503_v0, 0.0 }
 0x228   : > { %v583_v42 = vadd.f32 %v582_v41, %v568_v40 }
 0x22a   : > { %v584_v45 = vadd.f32 %v583_v42, %v569_v43 }
 0x22c   : > { %v585_v51 = vadd.f32 %v584_v45, %v570_v49 }
 0x236   : > { %v528_v53 = vpop.permute.xlu2 %527 }
 0x237   : > { %v573_v57 = vsel %vm74_vm8, %v528_v53, 0.0 }
 0x23e   : > { %v518_v46 = vpop.permute.xlu0 %517 }
 0x23f   : > { %v571_v50 = vsel %vm72_vm6, %v518_v46, 0.0 }
 0x240   : > { %v586_v52 = vadd.f32 %v585_v51, %v571_v50 }
 0x246   : > { %v523_v47 = vpop.permute.xlu1 %522 }
 0x247   : > { %v572_v48 = vsel %vm73_vm7, %v523_v47, 0.0 }
 0x248   : > { %v587_v55 = vadd.f32 %v586_v52, %v572_v48 }
 0x24a   : > { %v588_v59 = vadd.f32 %v587_v55, %v573_v57 }
 0x24e   : > { %v543_v62 = vpop.permute.xlu2 %542 }
 0x24f   : > { %v576_v38 = vsel %vm77_vm11, %v543_v62, 0.0 }
 0x256   : > { %v533_v56 = vpop.permute.xlu0 %532 }
 0x257   : > { %v574_v58 = vsel %vm75_vm9, %v533_v56, 0.0 }
 0x258   : > { %v589_v61 = vadd.f32 %v588_v59, %v574_v58 }
 0x25e   : > { %v538_v54 = vpop.permute.xlu1 %537 }
 0x25f   : > { %v575_v60 = vsel %vm76_vm10, %v538_v54, 0.0 }
 0x260   : > { %v590_v63 = vadd.f32 %v589_v61, %v575_v60 }
 0x262   : > { %v591_v40 = vadd.f32 %v590_v63, %v576_v38 }
 0x26c   : > { %v558_v43 = vpop.permute.xlu2 %557 }
 0x26d   : > { %v579_v45 = vsel %vm1160_vm14, %v558_v43, 0.0 }
 0x274   : > { %v548_v0 = vpop.permute.xlu0 %547 }
 0x275   : > { %v577_v39 = vsel %vm78_vm12, %v548_v0, 0.0 }
 0x276   : > { %v592_v42 = vadd.f32 %v591_v40, %v577_v39 }
 0x27c   : > { %v553_v1 = vpop.permute.xlu1 %552 }
 0x27d   : > { %v578_v41 = vsel %vm79_vm13, %v553_v1, 0.0 }
 0x27e   : > { %v593_v44 = vadd.f32 %v592_v42, %v578_v41 }
 0x280   : > { %v594_v46 = vadd.f32 %v593_v44, %v579_v45 }
 0x284   : > { %v605_v55 = vpop.permute.xlu1 %604 }
 0x285   : > { %v607_v54 = vperm.slane %v605_v55, 0 }
 0x28c   : > { %v563_v47 = vpop.permute.xlu0 %562 }
 0x28d   : > { %v580_v49 = vsel %vm1161_vm15, %v563_v47, 0.0 }
 0x28e   : > { %v595_v50 = vadd.f32 %v594_v46, %v580_v49 }
 0x290   : > { %v596_v51 = vrot.slane %v595_v50, 4 }
 0x292   : > { %v597_v48 = vadd.f32 %v596_v51, %v595_v50 }
 0x294   : > { %v598_v52 = vrot.slane %v597_v48, 2 }
 0x296   : > { %v599_v53 = vadd.f32 %v598_v52, %v597_v48 }
 0x298   : > { %v600_v56 = vrot.slane %v599_v53, 1 }
 0x29a   : > { %v601_v57 = vadd.f32 %v600_v56, %v599_v53 }
 0x29c   : > { %v608_v58 = vadd.f32 %v607_v54, %v601_v57 }
 0x29e   : > { %v691_v59 = vmul.f32 -1.442695, %v608_v58 }
 0x2a0   : > { %720 = vpow2.f32 %v691_v59 }
 0x2a6   : > { %v721_v60 = vpop.eup %720 }
 0x2a7   : > { %v612_v61 = vadd.f32 1.0, %v721_v60 }
 0x2a9   : > { %722 = vrcp.f32 %v612_v61  ;;  %v624_v1 = vand.u32 2147483648, %v612_v61  ;;  %v622_v39 = vand.u32 2147483647, %v612_v61  ;;  %vm618_vm15 = vweird.f32 %v612_v61 }
 0x2ab   : > { %v625_v41 = vor.u32 1.1754944e-38, %v624_v1  ;;  %vm623_vm1 = vcmp.eq.f32.partialorder %v622_v39, 8.507059e+37 }
 0x2af   : > { %v723_v62 = vpop.eup %722 }
 0x2b0   : > { %v614_v63 = vmul.f32 %v723_v62, %v612_v61  ;;  %vm619_vm14 = vweird.f32 %v723_v62 }
 0x2b1   : > { %vm620_vm0 = vmor %vm618_vm15, %vm619_vm14 }
 0x2b2   : > { %v615_v0 = vsub.f32 1.0, %v614_v63 }
 0x2b4   : > { %v616_v38 = vmul.f32 %v723_v62, %v615_v0 }
 0x2b6   : > { %v617_v40 = vadd.f32 %v723_v62, %v616_v38  ;;  %86 = sbr.rel (!%p84_p0) target bundleno = 13 (0xd), region = 57 }
 0x2b8   : > { %v621_v42 = vsel %vm620_vm0, %v723_v62, %v617_v40 }
 0x2b9   : > { %v626_v43 = vsel %vm623_vm1, %v625_v41, %v621_v42 }
 0x2ba   : > { %629 = vst [vmem:[%s628_s16] sm:$0x1] %v626_v43 }

</bundles_post_ra>
